<compile_context>
chip_gen: v5e
topology: v5e:2x2
jax: 0.10.0
libtpu: 0.0.40
codegen_flags: <defaults>
</compile_context>

<pallas_src>
import functools

import jax
import jax.numpy as jnp
from jax.experimental import pallas as pl
from jax.experimental.pallas import tpu as pltpu


# --------------------------------------------------------------------------
# per-tile focal math (shared between layouts)
# --------------------------------------------------------------------------

def _focal_modulation(one_minus_pt, gamma):
    g = float(gamma)
    if g == 2.0:
        return jnp.square(one_minus_pt)          # common case: one VALU multiply
    if g == 1.0:
        return one_minus_pt
    if g == 0.0:
        return jnp.ones_like(one_minus_pt)
    if g.is_integer():
        return jax.lax.integer_pow(one_minus_pt, int(g))
    return one_minus_pt ** g                     # non-integer gamma: EUP pow fallback


def _focal_from_stats(s, z_t, a_t, gamma):
    """s = sum_j exp(z_j), z_t = z[target], a_t = alpha[target] (all narrow cols/rows)."""
    ce = jnp.log(s) - z_t                        # cross-entropy per sample
    pt = jnp.exp(-ce)                            # softmax prob of target; replaces e_t/s
    one_minus_pt = jnp.maximum(1.0 - pt, 0.0)    # clamp rounding negatives (pt ~ 1)
    return a_t * _focal_modulation(one_minus_pt, gamma) * ce


def _focal_cols_T(x, t, a, gamma):
    """Samples-on-lanes layout. x: (C, L) logits, t: (1, L) int32, a: (C, 1). -> (1, L)."""
    x = x.astype(jnp.float32)                    # in-kernel f32 (v5e VPU/EUP lack bf16)
    a = a.astype(jnp.float32)
    # gather-by-mask (no dynamic vector gather on TPU). Out-of-range targets give an
    # all-False column -> that sample contributes 0 loss (documented divergence).
    cls = jax.lax.broadcasted_iota(jnp.int32, x.shape, 0)
    mask = cls == t                                               # (C, L) boolean
    m = jnp.max(x, axis=0, keepdims=True)                         # (1, L)
    z = x - m
    s = jnp.sum(jnp.exp(z), axis=0, keepdims=True)                # (1, L)
    z_t = jnp.sum(jnp.where(mask, z, 0.0), axis=0, keepdims=True)
    a_t = jnp.sum(jnp.where(mask, a, 0.0), axis=0, keepdims=True)
    return _focal_from_stats(s, z_t, a_t, gamma)                  # (1, L)


def _focal_rows(x, t, a, gamma):
    """Natural layout (C >= 128). x: (R, C), t: (R, 1) int32, a: (1, C). -> (R, 1)."""
    x = x.astype(jnp.float32)
    a = a.astype(jnp.float32)
    cls = jax.lax.broadcasted_iota(jnp.int32, x.shape, 1)
    mask = cls == t
    m = jnp.max(x, axis=-1, keepdims=True)
    z = x - m
    s = jnp.sum(jnp.exp(z), axis=-1, keepdims=True)
    z_t = jnp.sum(jnp.where(mask, z, 0.0), axis=-1, keepdims=True)
    a_t = jnp.sum(jnp.where(mask, a, 0.0), axis=-1, keepdims=True)
    return _focal_from_stats(s, z_t, a_t, gamma)


# --------------------------------------------------------------------------
# kernels
# --------------------------------------------------------------------------

def _sum_kernel_T(x_ref, t_ref, a_ref, o_ref, *, gamma, n_valid, tile_l):
    fl = _focal_cols_T(x_ref[...], t_ref[...], a_ref[...], gamma)        # (1, L)
    if n_valid % tile_l != 0:                                            # static skip
        col = pl.program_id(0) * tile_l + jax.lax.broadcasted_iota(jnp.int32, fl.shape, 1)
        fl = jnp.where(col < n_valid, fl, 0.0)
    part = jnp.sum(fl, axis=1, keepdims=True)                            # (1, 1)
    o_ref[...] = jnp.broadcast_to(part, o_ref.shape)                     # lane-dense (1,128) store


def _per_sample_kernel_T(x_ref, t_ref, a_ref, o_ref, *, gamma):
    # (1, tile) row output -> unmasked, lane-dense stores.
    o_ref[...] = _focal_cols_T(x_ref[...], t_ref[...], a_ref[...], gamma)


def _sum_kernel(x_ref, t_ref, a_ref, o_ref, *, gamma, n_valid, tile_n):
    fl = _focal_rows(x_ref[...], t_ref[...], a_ref[...], gamma)          # (R, 1)
    if n_valid % tile_n != 0:                                            # static skip
        row = pl.program_id(0) * tile_n + jax.lax.broadcasted_iota(jnp.int32, fl.shape, 0)
        fl = jnp.where(row < n_valid, fl, 0.0)
    part = jnp.sum(fl, axis=0, keepdims=True)
    o_ref[...] = jnp.broadcast_to(part, o_ref.shape)


def _per_sample_kernel(x_ref, t_ref, a_ref, o_ref, *, gamma):
    # TODO(synk): lane-dense (tile//128, 128) reshuffle of this (tile, 1) column output
    # for the C >= 128 path (the C < 128 path is already lane-dense).
    o_ref[...] = _focal_rows(x_ref[...], t_ref[...], a_ref[...], gamma)


# --------------------------------------------------------------------------
# tiling / VMEM helpers
# --------------------------------------------------------------------------

def _vmem_capacity_bytes():
    try:
        cap = int(pltpu.get_tpu_info().vmem_capacity_bytes)
        if cap > 0:
            return cap
    except Exception:
        pass
    return 64 << 20       # conservative default: v7x per-TensorCore VMEM


def _round_up(x, m):
    return -(-int(x) // m) * m


# --------------------------------------------------------------------------
# public wrapper
# --------------------------------------------------------------------------

def focal_loss(inputs, targets, alpha, gamma=2.0, reduction="mean"):
    """inputs: (N, C) logits (any float dtype); targets: (N,) int ids; alpha: (C,)."""
    N, C = inputs.shape
    itemsize = jnp.dtype(inputs.dtype).itemsize

    vmem_cap = _vmem_capacity_bytes()
    cap = min(vmem_cap // 2, 64 << 20)                      # scoped-VMEM budget for this kernel
    budget = (8 << 20) if vmem_cap >= (100 << 20) else (4 << 20)   # per-step logits bytes

    if C < 128:
        # ---------------- samples-on-lanes layout (full 128-lane utilization) ----------
        x = jnp.transpose(inputs)                           # (C, N): wrapper-side layout plumbing
        t = targets.astype(jnp.int32).reshape(1, N)
        a = jnp.asarray(alpha, jnp.float32).reshape(C, 1)

        tile = max(128, (budget // max(1, C * itemsize)) // 128 * 128)
        if tile >= N:
            # keep >= 2 grid points for megacore sharding when N is big enough
            tile = _round_up(pl.cdiv(N, 2), 128) if N >= 512 else N

        def need(tl):
            nbuf = 3 if pl.cdiv(N, tl) >= 3 else 2
            return (nbuf * tl * (C * itemsize + 4)           # logits + targets pipeline buffers
                    + 4 * C * tl * 4                         # live f32 intermediates
                    + 2 * C * 4 + (1 << 16))

        while tile > 128 and need(tile) > cap:
            tile = max(128, (tile // 2) // 128 * 128)

        num_tiles = int(pl.cdiv(N, tile))
        vmem_limit = int(min(max(need(tile) + (6 << 20), 16 << 20), cap))

        lspec_kwargs = {}
        if num_tiles >= 3:
            lspec_kwargs["pipeline_mode"] = pl.Buffered(3)   # deeper buffering (HBM-bound v5e)

        in_specs = [
            pl.BlockSpec((C, tile), lambda i: (0, i), **lspec_kwargs),   # logits, native dtype
            pl.BlockSpec((1, tile), lambda i: (0, i)),                   # targets
            pl.BlockSpec((C, 1), lambda i: (0, 0)),                      # alpha (resident)
        ]
        compiler_params = pltpu.CompilerParams(
            dimension_semantics=("parallel",),
            vmem_limit_bytes=vmem_limit,
        )

        if reduction not in ("sum", "mean"):
            out = pl.pallas_call(
                functools.partial(_per_sample_kernel_T, gamma=gamma),
                out_shape=jax.ShapeDtypeStruct((num_tiles, tile), jnp.float32),
                grid=(num_tiles,),
                in_specs=in_specs,
                out_specs=pl.BlockSpec((1, tile), lambda i: (i, 0)),
                compiler_params=compiler_params,
            )(x, t, a)
            return out.reshape(-1)[:N].astype(inputs.dtype)

        parts = pl.pallas_call(
            functools.partial(_sum_kernel_T, gamma=gamma, n_valid=N, tile_l=tile),
            out_shape=jax.ShapeDtypeStruct((num_tiles, 128), jnp.float32),
            grid=(num_tiles,),
            in_specs=in_specs,
            out_specs=pl.BlockSpec((1, 128), lambda i: (i, 0)),
            compiler_params=compiler_params,
        )(x, t, a)

    else:
        # ---------------- natural (N, C) layout: classes already fill the lanes --------
        # TODO(synk): for vocab-scale C on v7x (64 MiB VMEM) add a class-chunked
        # online-log-sum-exp variant (2-D grid with C on an inner "arbitrary" axis).
        x = inputs
        t = targets.astype(jnp.int32).reshape(N, 1)
        a = jnp.asarray(alpha, jnp.float32).reshape(1, C)

        sub = max(8, 32 // itemsize)                         # packed sublane multiple: 8/16/32
        tile = max(sub, (budget // max(1, C * itemsize)) // sub * sub)
        if tile >= N:
            tile = _round_up(pl.cdiv(N, 2), sub) if N >= 512 else N

        def need(tr):
            nbuf = 3 if pl.cdiv(N, tr) >= 3 else 2
            return (nbuf * tr * (C * itemsize + 4)
                    + 4 * C * tr * 4 + 2 * C * 4 + (1 << 16))

        while tile > sub and need(tile) > cap:
            tile = max(sub, (tile // 2) // sub * sub)

        num_tiles = int(pl.cdiv(N, tile))
        vmem_limit = int(min(max(need(tile) + (6 << 20), 16 << 20), cap))

        lspec_kwargs = {}
        if num_tiles >= 3:
            lspec_kwargs["pipeline_mode"] = pl.Buffered(3)

        in_specs = [
            pl.BlockSpec((tile, C), lambda i: (i, 0), **lspec_kwargs),
            pl.BlockSpec((tile, 1), lambda i: (i, 0)),
            pl.BlockSpec((1, C), lambda i: (0, 0)),
        ]
        compiler_params = pltpu.CompilerParams(
            dimension_semantics=("parallel",),
            vmem_limit_bytes=vmem_limit,
        )

        if reduction not in ("sum", "mean"):
            out = pl.pallas_call(
                functools.partial(_per_sample_kernel, gamma=gamma),
                out_shape=jax.ShapeDtypeStruct((N, 1), jnp.float32),
                grid=(num_tiles,),
                in_specs=in_specs,
                out_specs=pl.BlockSpec((tile, 1), lambda i: (i, 0)),
                compiler_params=compiler_params,
            )(x, t, a)
            return out[:, 0].astype(inputs.dtype)

        parts = pl.pallas_call(
            functools.partial(_sum_kernel, gamma=gamma, n_valid=N, tile_n=tile),
            out_shape=jax.ShapeDtypeStruct((num_tiles, 128), jnp.float32),
            grid=(num_tiles,),
            in_specs=in_specs,
            out_specs=pl.BlockSpec((1, 128), lambda i: (i, 0)),
            compiler_params=compiler_params,
        )(x, t, a)

    total = jnp.sum(parts[:, 0])
    if reduction == "mean":
        total = total / N       # matches the module: mean over samples (not sum of alpha_t)
    return total.astype(inputs.dtype)


# --------------------------------------------------------------------------
# pure-JAX reference + demo
# --------------------------------------------------------------------------

def _focal_loss_ref(inputs, targets, alpha, gamma=2.0, reduction="mean"):
    logp = jax.nn.log_softmax(inputs.astype(jnp.float32), axis=-1)
    ce = -jnp.take_along_axis(logp, targets[:, None], axis=-1)[:, 0]
    pt = jnp.exp(-ce)
    fl = alpha[targets] * (1.0 - pt) ** gamma * ce
    if reduction == "sum":
        return jnp.sum(fl)
    if reduction == "mean":
        return jnp.mean(fl)
    return fl


if __name__ == "__main__":
    N, C = 8, 16  # small shapes: 8 samples, 16 classes

    key = jax.random.PRNGKey(0)
    k1, k2, k3 = jax.random.split(key, 3)
    inputs = jax.random.normal(k1, (N, C), dtype=jnp.float32)
    targets = jax.random.randint(k2, (N,), 0, C, dtype=jnp.int32)
    # deterministic per-class alpha weights (the module's alpha tensor, length C)
    alpha = jax.random.uniform(k3, (C,), dtype=jnp.float32, minval=0.25, maxval=1.0)

    out = focal_loss(inputs, targets, alpha, gamma=2.0, reduction="mean")
    out = jax.block_until_ready(out)

    ref = _focal_loss_ref(inputs, targets, alpha, gamma=2.0, reduction="mean")
    assert jnp.allclose(out, ref, rtol=1e-5, atol=1e-6), (out, ref)
    print("KERNEL_OK")
</pallas_src>

<mosaic_0001>
module attributes {stable_mosaic.version = 11 : i64} {
  func.func @_sum_kernel_T(%arg0: i32, %arg1: memref<16x8xf32, #tpu.memory_space<vmem>>, %arg2: memref<1x8xi32, #tpu.memory_space<vmem>>, %arg3: memref<16x1xf32, #tpu.memory_space<vmem>>, %arg4: memref<1x128xf32, #tpu.memory_space<vmem>>) attributes {dimension_semantics = [#tpu.dimension_semantics<parallel>], iteration_bounds = array<i64: 1>, scalar_prefetch = 0 : i64, scratch_operands = 0 : i64, tpu.core_type = #tpu.core_type<tc>, window_params = [{transform_indices = @transform_0, window_bounds = array<i64: 16, 8>}, {transform_indices = @transform_1, window_bounds = array<i64: 1, 8>}, {pipeline_mode = #tpu.pipeline_mode<synchronous>, transform_indices = @transform_2, window_bounds = array<i64: 16, 1>}, {transform_indices = @transform_3, window_bounds = array<i64: 1, 128>}]} {
    %c0 = arith.constant 0 : index
    %c0_0 = arith.constant 0 : index
    %0 = vector.load %arg1[%c0, %c0_0] : memref<16x8xf32, #tpu.memory_space<vmem>>, vector<16x8xf32>
    %c0_1 = arith.constant 0 : index
    %c0_2 = arith.constant 0 : index
    %1 = vector.load %arg2[%c0_1, %c0_2] : memref<1x8xi32, #tpu.memory_space<vmem>>, vector<1x8xi32>
    %c0_3 = arith.constant 0 : index
    %c0_4 = arith.constant 0 : index
    %2 = vector.load %arg3[%c0_3, %c0_4] : memref<16x1xf32, #tpu.memory_space<vmem>>, vector<16x1xf32>
    %3 = tpu.iota {dimensions = array<i32: 0>} : vector<16x8xi32>
    %4 = vector.broadcast %1 : vector<1x8xi32> to vector<16x8xi32>
    %5 = arith.cmpi eq, %3, %4 : vector<16x8xi32>
    %cst = arith.constant dense<0xFF800000> : vector<8xf32>
    %6 = vector.multi_reduction <maximumf>, %0, %cst [0] : vector<16x8xf32> to vector<8xf32>
    %7 = vector.shape_cast %6 : vector<8xf32> to vector<1x8xf32>
    %8 = vector.broadcast %7 : vector<1x8xf32> to vector<16x8xf32>
    %9 = arith.subf %0, %8 : vector<16x8xf32>
    %10 = math.exp %9 : vector<16x8xf32>
    %cst_5 = arith.constant dense<0.000000e+00> : vector<8xf32>
    %11 = vector.multi_reduction <add>, %10, %cst_5 [0] : vector<16x8xf32> to vector<8xf32>
    %12 = vector.shape_cast %11 : vector<8xf32> to vector<1x8xf32>
    %cst_6 = arith.constant 0.000000e+00 : f32
    %13 = vector.broadcast %cst_6 : f32 to vector<16x8xf32>
    %14 = arith.select %5, %9, %13 : vector<16x8xi1>, vector<16x8xf32>
    %cst_7 = arith.constant dense<0.000000e+00> : vector<8xf32>
    %15 = vector.multi_reduction <add>, %14, %cst_7 [0] : vector<16x8xf32> to vector<8xf32>
    %16 = vector.shape_cast %15 : vector<8xf32> to vector<1x8xf32>
    %cst_8 = arith.constant 0.000000e+00 : f32
    %17 = vector.shape_cast %2 : vector<16x1xf32> to vector<16x1xf32>
    %18 = vector.broadcast %17 : vector<16x1xf32> to vector<16x8xf32>
    %19 = vector.broadcast %cst_8 : f32 to vector<16x8xf32>
    %20 = arith.select %5, %18, %19 : vector<16x8xi1>, vector<16x8xf32>
    %cst_9 = arith.constant dense<0.000000e+00> : vector<8xf32>
    %21 = vector.multi_reduction <add>, %20, %cst_9 [0] : vector<16x8xf32> to vector<8xf32>
    %22 = vector.shape_cast %21 : vector<8xf32> to vector<1x8xf32>
    %23 = math.log %12 : vector<1x8xf32>
    %24 = arith.subf %23, %16 : vector<1x8xf32>
    %cst_10 = arith.constant 0.000000e+00 : f32
    %25 = vector.broadcast %cst_10 : f32 to vector<1x8xf32>
    %26 = arith.subf %25, %24 : vector<1x8xf32>
    %27 = math.exp %26 : vector<1x8xf32>
    %cst_11 = arith.constant 1.000000e+00 : f32
    %28 = vector.broadcast %cst_11 : f32 to vector<1x8xf32>
    %29 = arith.subf %28, %27 : vector<1x8xf32>
    %cst_12 = arith.constant 0.000000e+00 : f32
    %30 = vector.broadcast %cst_12 : f32 to vector<1x8xf32>
    %31 = arith.maximumf %29, %30 : vector<1x8xf32>
    %32 = arith.mulf %31, %31 : vector<1x8xf32>
    %33 = arith.mulf %22, %32 : vector<1x8xf32>
    %34 = arith.mulf %33, %24 : vector<1x8xf32>
    %cst_13 = arith.constant dense<0.000000e+00> : vector<1xf32>
    %35 = vector.multi_reduction <add>, %34, %cst_13 [1] : vector<1x8xf32> to vector<1xf32>
    %36 = vector.shape_cast %35 : vector<1xf32> to vector<1x1xf32>
    %37 = vector.shape_cast %36 : vector<1x1xf32> to vector<1x1xf32>
    %38 = vector.broadcast %37 : vector<1x1xf32> to vector<1x128xf32>
    %c0_14 = arith.constant 0 : index
    %c0_15 = arith.constant 0 : index
    %39 = vector.load %arg4[%c0_14, %c0_15] : memref<1x128xf32, #tpu.memory_space<vmem>>, vector<1x128xf32>
    tpu.vector_store %arg4[%c0_14, %c0_15], %38 {strides = array<i32>} : memref<1x128xf32, #tpu.memory_space<vmem>>, vector<1x128xf32>,
    return
  }
  func.func @transform_0(%arg0: i32) -> (i32, i32) {
    %c0_i32 = arith.constant 0 : i32
    %c0_i32_0 = arith.constant 0 : i32
    return %c0_i32, %arg0 : i32, i32
  }
  func.func @transform_1(%arg0: i32) -> (i32, i32) {
    %c0_i32 = arith.constant 0 : i32
    %c0_i32_0 = arith.constant 0 : i32
    return %c0_i32, %arg0 : i32, i32
  }
  func.func @transform_2(%arg0: i32) -> (i32, i32) {
    %c0_i32 = arith.constant 0 : i32
    %c0_i32_0 = arith.constant 0 : i32
    %c0_i32_1 = arith.constant 0 : i32
    return %c0_i32, %c0_i32_0 : i32, i32
  }
  func.func @transform_3(%arg0: i32) -> (i32, i32) {
    %c0_i32 = arith.constant 0 : i32
    %c0_i32_0 = arith.constant 0 : i32
    return %arg0, %c0_i32 : i32, i32
  }
}

</mosaic_0001>

<bundles_post_ra>
// kernel: tpu_custom_call.1
= control target key start
LH: loop header
LB: loop body
LE: loop exit
PB: predicated region body
PF: predicated region fallthrough
CT: control target
= control target key end

     0   :  { %v152_v1 = vmov 0   ;;  %s205_s0 = inlined_call_operand.vmem [shape: f32[16,8], index: 0, kind: input, shape index: {}]   ;;  %s206_s1 = inlined_call_operand.vmem [shape: s32[1,8], index: 1, kind: input, shape index: {}]   ;;  %s207_s2 = inlined_call_operand.vmem [shape: f32[16,1], index: 2, kind: input, shape index: {}]   ;;  %s208_s3 = inlined_call_operand.hbm [shape: f32[1,128], index: 3, kind: output, shape index: {}]  }
   0x1   :  { %v18_v0 = vld [vmem:[%s207_s2] sm:$0xff]  ;;  %116 = vset.pattern.permute.xlu0 %v152_v1 }
   0x2   :  { %8 = vsyncpa [#allocation3], 0  ;;  %64 = vperm.xlu0 %116, %v18_v0   ;;  %v19_v2 = vld [vmem:[%s207_s2 + $0x8] sm:$0xff]  ;;  %vm26_vm0 = vcmask 64512   ;;  %v15_v3 = vld [vmem:[%s205_s0] sm:$0xff]  ;;  %v20_v18 = vlaneseq  ;;  %s105_s23 = sshll.u32 %s208_s3, 4  ;;  %s106_s23 = int_to_ptr.hbm [resolvable:$true] %s105_s23 }
   0x3   :  { %v16_v4 = vld [vmem:[%s205_s0 + $0x8] sm:$0xff]  ;;  %v27_v5 = vsel %vm26_vm0, %v15_v3, -inf  ;;  %v117_v25 = vld [vmem:[%s206_s1] ss:$0 sm:$0xff]  ;;  %s153_s1 = smov [#allocation2]  }
   0x4   :  { %v28_v6 = vsel %vm26_vm0, %v16_v4, -inf  ;;  %v21_v22 = vshrl.u32 %v20_v18, 7  ;;  %s103_s20 = sshll.u32 %s153_s1, 4  ;;  %s104_s20 = int_to_ptr.vmem [resolvable:$true] %s103_s20 }
   0x5   :  { %v29_v7 = vmax.f32 %v27_v5, %v28_v6 }
   0x6   :  { %v22_v26 = vadd.s32 8, %v21_v22  ;;  %vm24_vm1 = vcmp.eq.s32.totalorder %v21_v22, %v117_v25 }
   0x7   :  { %v30_v8 = vrot.slane %v29_v7, 4 }
   0x8   :  { %vm25_vm2 = vcmp.eq.s32.totalorder %v22_v26, %v117_v25 }
   0x9   :  { %v31_v9 = vmax.f32 %v29_v7, %v30_v8 }
   0xa   :  { %69 = vperm.xlu0 %116, %v19_v2  }
   0xb   :  { %v32_v10 = vrot.slane %v31_v9, 2 }
   0xd   :  { %v33_v11 = vmax.f32 %v31_v9, %v32_v10 }
   0xf   :  { %v34_v12 = vrot.slane %v33_v11, 1 }
  0x11   :  { %v35_v13 = vmax.f32 %v33_v11, %v34_v12 }
  0x13   :  { %v36_v14 = vsub.f32 %v15_v3, %v35_v13  ;;  %v37_v15 = vsub.f32 %v16_v4, %v35_v13 }
  0x15   :  { %v38_v16 = vmul.f32 1.442695, %v36_v14  ;;  %v40_v17 = vmul.f32 1.442695, %v37_v15  ;;  %v51_v28 = vsel %vm24_vm1, %v36_v14, 0.0  ;;  %v52_v29 = vsel %vm25_vm2, %v37_v15, 0.0 }
  0x16   :  { %v53_v31 = vsel %vm26_vm0, %v51_v28, 0.0  ;;  %v54_v32 = vsel %vm26_vm0, %v52_v29, 0.0 }
  0x17   :  { %118 = vpow2.f32 %v38_v16  ;;  %v55_v34 = vadd.f32 %v54_v32, %v53_v31 }
  0x18   :  { %120 = vpow2.f32 %v40_v17 }
  0x19   :  { %v56_v36 = vrot.slane %v55_v34, 4 }
  0x1b   :  { %v57_v38 = vadd.f32 %v56_v36, %v55_v34 }
  0x1d   :  { %v119_v19 = vpop.eup %118  ;;  %v58_v40 = vrot.slane %v57_v38, 2 }
  0x1e   :  { %v121_v20 = vpop.eup %120  ;;  %v42_v21 = vsel %vm26_vm0, %v119_v19, 0.0 }
  0x1f   :  { %v43_v23 = vsel %vm26_vm0, %v121_v20, 0.0  ;;  %v59_v41 = vadd.f32 %v58_v40, %v57_v38 }
  0x20   :  { %v44_v24 = vadd.f32 %v43_v23, %v42_v21 }
  0x21   :  { %v60_v42 = vrot.slane %v59_v41, 1 }
  0x22   :  { %v45_v27 = vrot.slane %v44_v24, 4 }
  0x23   :  { %v61_v44 = vadd.f32 %v60_v42, %v59_v41 }
  0x24   :  { %v46_v30 = vadd.f32 %v45_v27, %v44_v24 }
  0x26   :  { %v47_v33 = vrot.slane %v46_v30, 2 }
  0x28   :  { %v48_v35 = vadd.f32 %v47_v33, %v46_v30 }
  0x2a   :  { %v49_v37 = vrot.slane %v48_v35, 1 }
  0x2c   :  { %v50_v39 = vadd.f32 %v49_v37, %v48_v35 }
  0x2e   :  { %122 = vlog2.f32 %v50_v39 }
  0x34   :  { %v123_v43 = vpop.eup %122 }
  0x35   :  { %v84_v45 = vmul.f32 0.6931472, %v123_v43 }
  0x37   :  { %v85_v46 = vsub.f32 %v84_v45, %v61_v44 }
  0x39   :  { %v86_v47 = vsub.f32 0.0, %v85_v46 }
  0x3b   :  { %v87_v49 = vmul.f32 1.442695, %v86_v47 }
  0x3d   :  { %124 = vpow2.f32 %v87_v49 }
  0x43   :  { %v125_v53 = vpop.eup %124 }
  0x44   :  { %v89_v58 = vsub.f32 1.0, %v125_v53 }
  0x46   :  { %v90_v61 = vmax.f32 %v89_v58, 0.0 }
  0x48   :  { %v91_v0 = vmul.f32 %v90_v61, %v90_v61 }
  0x74   :  { %v65_v48 = vpop.permute.xlu0 %64 }
  0x75   :  { %v72_v50 = vsel %vm24_vm1, %v65_v48, 0.0 }
  0x76   :  { %v74_v54 = vsel %vm26_vm0, %v72_v50, 0.0 }
  0x7c   :  { %v70_v51 = vpop.permute.xlu0 %69 }
  0x7d   :  { %v73_v52 = vsel %vm25_vm2, %v70_v51, 0.0 }
  0x7e   :  { %v75_v55 = vsel %vm26_vm0, %v73_v52, 0.0 }
  0x7f   :  { %v76_v56 = vadd.f32 %v75_v55, %v74_v54 }
  0x81   :  { %v77_v57 = vrot.slane %v76_v56, 4 }
  0x83   :  { %v78_v59 = vadd.f32 %v77_v57, %v76_v56 }
  0x85   :  { %v79_v60 = vrot.slane %v78_v59, 2 }
  0x87   :  { %v80_v62 = vadd.f32 %v79_v60, %v78_v59 }
  0x89   :  { %v81_v63 = vrot.slane %v80_v62, 1 }
  0x8b   :  { %v82_v1 = vadd.f32 %v81_v63, %v80_v62 }
  0x8d   :  { %v92_v2 = vmul.f32 %v91_v0, %v82_v1 }
  0x8f   :  { %v93_v3 = vmul.f32 %v92_v2, %v85_v46 }
  0x91   :  { %v94_v4 = vsel %vm26_vm0, %v93_v3, 0.0 }
  0x92   :  { %95 = vadd.xlane.f32.xlu1 %v94_v4 }
 0x105   :  { %v96_v5 = vpop.xlane.xlu1 %95 }
 0x106   :  { %97 = vst [vmem:[#allocation2] sm:$0x1] %v96_v5 }
 0x107   :  { %108 = dma.vmem_to_hbm [thread:$0]  %s104_s20, 16, %s106_s23, [#allocation3]  }
 0x108   :  { %150 = dma.done.wait [#allocation3], 16  }
 0x109   :  { %151 = vsyncadd [#allocation3], 4294967280 }
 0x10a   :  { %113 = vsyncpa [#allocation3], 1 }

</bundles_post_ra>
